<compile_context>
chip_gen: v6e
topology: v6e:2x2x1
jax: 0.10.0
libtpu: 0.0.40
codegen_flags: <defaults>
</compile_context>

<pallas_src>
import math

import numpy as np
import jax
import jax.numpy as jnp
from jax.experimental import pallas as pl
from jax.experimental.pallas import tpu as pltpu


# ----------------------- host-side constant construction -----------------------
def get_freq_indices(method):
    assert method in ['top1', 'top2', 'top4', 'top8', 'top16', 'top32',
                      'bot1', 'bot2', 'bot4', 'bot8', 'bot16', 'bot32',
                      'low1', 'low2', 'low4', 'low8', 'low16', 'low32']
    num_freq = int(method[3:])
    if 'top' in method:
        all_x = [0, 0, 6, 0, 0, 1, 1, 4, 5, 1, 3, 0, 0, 0, 3, 2,
                 4, 6, 3, 5, 5, 2, 6, 5, 5, 3, 3, 4, 2, 2, 6, 1]
        all_y = [0, 1, 0, 5, 2, 0, 2, 0, 0, 6, 0, 4, 6, 3, 5, 2,
                 6, 3, 3, 3, 5, 1, 1, 2, 4, 2, 1, 1, 3, 0, 5, 3]
    elif 'low' in method:
        all_x = [0, 0, 1, 1, 0, 2, 2, 1, 2, 0, 3, 4, 0, 1, 3, 0,
                 1, 2, 3, 4, 5, 0, 1, 2, 3, 4, 5, 6, 1, 2, 3, 4]
        all_y = [0, 1, 0, 1, 2, 0, 1, 2, 2, 3, 0, 0, 4, 3, 1, 5,
                 4, 3, 2, 1, 0, 6, 5, 4, 3, 2, 1, 0, 6, 5, 4, 3]
    else:  # 'bot'
        all_x = [6, 1, 3, 3, 2, 4, 1, 2, 4, 4, 5, 1, 4, 6, 2, 5,
                 6, 1, 6, 2, 2, 4, 3, 3, 5, 5, 6, 2, 5, 5, 3, 6]
        all_y = [6, 4, 4, 6, 6, 3, 1, 4, 4, 5, 6, 5, 2, 2, 5, 1,
                 4, 3, 5, 0, 3, 1, 1, 2, 4, 2, 1, 1, 5, 3, 3, 3]
    return all_x[:num_freq], all_y[:num_freq]


def _build_filter(pos, freq, POS):
    result = math.cos(math.pi * freq * (pos + 0.5) / POS) / math.sqrt(POS)
    return result if freq == 0 else result * math.sqrt(2.0)


def get_dct_filter(tile_size_x, tile_size_y, mapper_x, mapper_y, channel):
    """Matches MultiSpectralDCTLayer.get_dct_filter.  Returns np (C, Hd, Wd)."""
    dct_filter = np.zeros((channel, tile_size_x, tile_size_y), dtype=np.float32)
    c_part = channel // len(mapper_x)
    for i, (u_x, v_y) in enumerate(zip(mapper_x, mapper_y)):
        for t_x in range(tile_size_x):
            for t_y in range(tile_size_y):
                dct_filter[i * c_part:(i + 1) * c_part, t_x, t_y] = (
                    _build_filter(t_x, u_x, tile_size_x)
                    * _build_filter(t_y, v_y, tile_size_y))
    return dct_filter


def _adaptive_bins(in_size, out_size):
    # Same bin boundaries as torch.nn.functional.adaptive_avg_pool2d.
    starts = [(i * in_size) // out_size for i in range(out_size)]
    ends = [-(-((i + 1) * in_size) // out_size) for i in range(out_size)]  # ceil div
    return starts, ends


def build_effective_weight(dct_filter, in_h, in_w):
    """Fold adaptive_avg_pool2d(H,W -> Hd,Wd) into the DCT weight.

    sum_{hw'} pool(x)[c,hw'] * w[c,hw'] == sum_{hw} x[c,hw] * w_eff[c,hw]
    Returns (C, in_h*in_w) float32 (channel-major: matches native NCHW reads).
    Uses '+=' so overlapping adaptive-pool bins (non-divisible sizes) are correct.
    """
    dct_filter = np.asarray(dct_filter, dtype=np.float32)
    C, dct_h, dct_w = dct_filter.shape
    w_eff = np.zeros((C, in_h, in_w), dtype=np.float32)
    hs, he = _adaptive_bins(in_h, dct_h)
    ws, we = _adaptive_bins(in_w, dct_w)
    for i in range(dct_h):
        for j in range(dct_w):
            bin_sz = (he[i] - hs[i]) * (we[j] - ws[j])
            w_eff[:, hs[i]:he[i], ws[j]:we[j]] += (
                dct_filter[:, i, j][:, None, None] / float(bin_sz))
    return np.ascontiguousarray(w_eff.reshape(C, in_h * in_w))  # (C, HW)


# --------------------------------- fused kernel ---------------------------------
def _msa_kernel(x_ref, dctw_ref, w1_ref, w2_ref, o_ref):
    # x_ref: (TB, C, HW) native-layout activations; dctw_ref: (C, HW)
    # w1_ref: (C, Cr); w2_ref: (Cr, C); o_ref: (TB, C)
    x = x_ref[...]
    w = dctw_ref[...]
    # Spectral (DCT) pooling: per-channel weighted spatial sum (lane-axis reduce).
    y = jnp.sum(x * w, axis=-1)                                        # (TB, C)
    # fc1 -> ReLU
    h = jnp.dot(y, w1_ref[...], preferred_element_type=jnp.float32)    # (TB, Cr)
    h = jnp.maximum(h, 0.0)
    # fc2 -> sigmoid
    s = jnp.dot(h, w2_ref[...], preferred_element_type=jnp.float32)    # (TB, C)
    o_ref[...] = 1.0 / (1.0 + jnp.exp(-s))


def multispectral_attention(x, dct_filter, w1, w2, dct_h, dct_w,
                            per_buffer_vmem_bytes=6 * 1024 * 1024):
    """x: (N, C, H, W) f32 -> channel attention (N, C, 1, 1) f32.

    dct_filter: (C, dct_h, dct_w) numpy constant (as registered in the torch module).
    w1: (C, C//reduction), w2: (C//reduction, C)  -- torch Linear weights transposed.
    """
    N, C, H, W = x.shape
    HW = H * W
    Cr = w1.shape[1]

    # adaptive_avg_pool2d + DCT weighting folded into one (C, HW) weight.
    w_eff = jnp.asarray(build_effective_weight(dct_filter, H, W))

    # Native NCHW layout, only flattened (contiguous, free) - no HBM transpose pass.
    x_flat = x.reshape(N, C, HW)

    # Batch-tile size TB: as large as the per-buffer VMEM budget allows
    # (double-buffered by the pipeline), but keep the grid length >= 2 so the
    # second TensorCore on v7x gets work.
    tb = max(1, per_buffer_vmem_bytes // (C * HW * 4))
    tb = min(tb, 256)
    if N >= 2:
        tb = min(tb, -(-N // 2))      # ceil(N/2)  -> grid >= 2
    tb = max(1, min(tb, N))
    grid = pl.cdiv(N, tb)
    n_pad = grid * tb
    if n_pad != N:
        # Pad the batch so blocks tile exactly; padded rows are sliced off below.
        x_flat = jnp.pad(x_flat, ((0, n_pad - N), (0, 0), (0, 0)))

    out = pl.pallas_call(
        _msa_kernel,
        out_shape=jax.ShapeDtypeStruct((grid, tb, C), jnp.float32),
        grid=(grid,),
        in_specs=[
            pl.BlockSpec((tb, C, HW), lambda n: (n, 0, 0)),   # activations (TB samples)
            pl.BlockSpec((C, HW), lambda n: (0, 0)),          # folded DCT weight
            pl.BlockSpec((C, Cr), lambda n: (0, 0)),          # fc1 weight
            pl.BlockSpec((Cr, C), lambda n: (0, 0)),          # fc2 weight
        ],
        out_specs=pl.BlockSpec((None, tb, C), lambda n: (n, 0, 0)),
        compiler_params=pltpu.CompilerParams(
            dimension_semantics=("parallel",),                # both TCs on v7x
            vmem_limit_bytes=32 * 1024 * 1024),
    )(x_flat, w_eff, w1, w2)

    return out.reshape(n_pad, C)[:N].reshape(N, C, 1, 1)


# ------------------------------- pure-JAX reference ------------------------------
def ref_multispectral_attention(x, dct_filter, w1, w2, dct_h, dct_w):
    N, C, H, W = x.shape
    if (H, W) != (dct_h, dct_w):
        # test cases use evenly divisible sizes; general bins handled in Pallas path
        assert H % dct_h == 0 and W % dct_w == 0
        x_p = x.reshape(N, C, dct_h, H // dct_h, dct_w, W // dct_w).mean(axis=(3, 5))
    else:
        x_p = x
    y = jnp.sum(x_p * dct_filter[None], axis=(2, 3))   # (N, C)  -- MultiSpectralDCTLayer
    h = jnp.maximum(y @ w1, 0.0)                       # Linear + ReLU
    return jax.nn.sigmoid(h @ w2).reshape(N, C, 1, 1)  # Linear + Sigmoid -> (N,C,1,1)


# ------------------------------------- main --------------------------------------
if __name__ == "__main__":
    channel, reduction = 64, 16
    dct_h = dct_w = 7
    freq_sel_method = 'top16'

    mapper_x, mapper_y = get_freq_indices(freq_sel_method)
    mapper_x = [mx * (dct_h // 7) for mx in mapper_x]
    mapper_y = [my * (dct_w // 7) for my in mapper_y]
    dct_filter_np = get_dct_filter(dct_h, dct_w, mapper_x, mapper_y, channel)
    dct_filter_j = jnp.asarray(dct_filter_np)

    key = jax.random.PRNGKey(0)
    k1, k2, k3, k4, k5 = jax.random.split(key, 5)
    # torch Linear stores (out, in); keep transposed (in, out) so kernel does x @ W.
    w1 = jax.random.normal(k1, (channel, channel // reduction), jnp.float32) * 0.1
    w2 = jax.random.normal(k2, (channel // reduction, channel), jnp.float32) * 0.1

    # Case 1: H == dct_h  -> no pooling path.
    x1 = jax.random.normal(k3, (2, channel, 7, 7), jnp.float32)
    # Case 2: H != dct_h  -> adaptive_avg_pool2d folded into the effective DCT weight.
    x2 = jax.random.normal(k4, (2, channel, 14, 14), jnp.float32)
    # Case 3: batch not a multiple of the tile -> exercises padding + TB > 1 blocks.
    x3 = jax.random.normal(k5, (9, channel, 7, 7), jnp.float32)

    for x in (x1, x2, x3):
        out = jax.block_until_ready(
            multispectral_attention(x, dct_filter_np, w1, w2, dct_h, dct_w))
        ref = ref_multispectral_attention(x, dct_filter_j, w1, w2, dct_h, dct_w)
        assert out.shape == (x.shape[0], channel, 1, 1)
        assert jnp.allclose(out, ref, rtol=1e-4, atol=1e-4), \
            float(jnp.max(jnp.abs(out - ref)))

    print("KERNEL_OK")
</pallas_src>

<mosaic_0001>
module attributes {stable_mosaic.version = 11 : i64} {
  func.func @_msa_kernel(%arg0: i32, %arg1: memref<1x64x49xf32, #tpu.memory_space<vmem>>, %arg2: memref<64x49xf32, #tpu.memory_space<vmem>>, %arg3: memref<64x4xf32, #tpu.memory_space<vmem>>, %arg4: memref<4x64xf32, #tpu.memory_space<vmem>>, %arg5: memref<1x1x64xf32, #tpu.memory_space<vmem>>) attributes {dimension_semantics = [#tpu.dimension_semantics<parallel>], iteration_bounds = array<i64: 2>, scalar_prefetch = 0 : i64, scratch_operands = 0 : i64, tpu.core_type = #tpu.core_type<tc>, window_params = [{transform_indices = @transform_0, window_bounds = array<i64: 1, 64, 49>}, {pipeline_mode = #tpu.pipeline_mode<synchronous>, transform_indices = @transform_1, window_bounds = array<i64: 64, 49>}, {pipeline_mode = #tpu.pipeline_mode<synchronous>, transform_indices = @transform_2, window_bounds = array<i64: 64, 4>}, {pipeline_mode = #tpu.pipeline_mode<synchronous>, transform_indices = @transform_3, window_bounds = array<i64: 4, 64>}, {transform_indices = @transform_4, window_bounds = array<i64: 1, 1, 64>}]} {
    %c0 = arith.constant 0 : index
    %c0_0 = arith.constant 0 : index
    %c0_1 = arith.constant 0 : index
    %0 = vector.load %arg1[%c0, %c0_0, %c0_1] : memref<1x64x49xf32, #tpu.memory_space<vmem>>, vector<1x64x49xf32>
    %c0_2 = arith.constant 0 : index
    %c0_3 = arith.constant 0 : index
    %1 = vector.load %arg2[%c0_2, %c0_3] : memref<64x49xf32, #tpu.memory_space<vmem>>, vector<64x49xf32>
    %2 = vector.shape_cast %1 : vector<64x49xf32> to vector<1x64x49xf32>
    %3 = arith.mulf %0, %2 : vector<1x64x49xf32>
    %cst = arith.constant dense<0.000000e+00> : vector<1x64xf32>
    %4 = vector.multi_reduction <add>, %3, %cst [2] : vector<1x64x49xf32> to vector<1x64xf32>
    %c0_4 = arith.constant 0 : index
    %c0_5 = arith.constant 0 : index
    %5 = vector.load %arg3[%c0_4, %c0_5] : memref<64x4xf32, #tpu.memory_space<vmem>>, vector<64x4xf32>
    %cst_6 = arith.constant dense<0.000000e+00> : vector<1x4xf32>
    %6 = tpu.matmul %4, %5, %cst_6 {dimension_numbers = #tpu.dot_dimension_numbers<[1], [0], [0], [1], [0, 0, 1, 1], [], []>} : vector<1x64xf32>, vector<64x4xf32>, vector<1x4xf32> -> vector<1x4xf32>
    %cst_7 = arith.constant 0.000000e+00 : f32
    %7 = vector.broadcast %cst_7 : f32 to vector<1x4xf32>
    %8 = arith.maximumf %6, %7 : vector<1x4xf32>
    %c0_8 = arith.constant 0 : index
    %c0_9 = arith.constant 0 : index
    %9 = vector.load %arg4[%c0_8, %c0_9] : memref<4x64xf32, #tpu.memory_space<vmem>>, vector<4x64xf32>
    %cst_10 = arith.constant dense<0.000000e+00> : vector<1x64xf32>
    %10 = tpu.matmul %8, %9, %cst_10 {dimension_numbers = #tpu.dot_dimension_numbers<[1], [0], [0], [1], [0, 0, 1, 1], [], []>} : vector<1x4xf32>, vector<4x64xf32>, vector<1x64xf32> -> vector<1x64xf32>
    %cst_11 = arith.constant 0.000000e+00 : f32
    %11 = vector.broadcast %cst_11 : f32 to vector<1x64xf32>
    %12 = arith.subf %11, %10 : vector<1x64xf32>
    %13 = math.exp %12 : vector<1x64xf32>
    %cst_12 = arith.constant 1.000000e+00 : f32
    %14 = vector.broadcast %cst_12 : f32 to vector<1x64xf32>
    %15 = arith.addf %14, %13 : vector<1x64xf32>
    %cst_13 = arith.constant 1.000000e+00 : f32
    %16 = vector.broadcast %cst_13 : f32 to vector<1x64xf32>
    %17 = arith.divf %16, %15 : vector<1x64xf32>
    %c0_14 = arith.constant 0 : index
    %c0_15 = arith.constant 0 : index
    %c0_16 = arith.constant 0 : index
    %18 = vector.load %arg5[%c0_14, %c0_15, %c0_16] : memref<1x1x64xf32, #tpu.memory_space<vmem>>, vector<1x1x64xf32>
    %19 = vector.shape_cast %18 : vector<1x1x64xf32> to vector<1x64xf32>
    %20 = vector.shape_cast %17 : vector<1x64xf32> to vector<1x1x64xf32>
    tpu.vector_store %arg5[%c0_14, %c0_15, %c0_16], %20 {strides = array<i32>} : memref<1x1x64xf32, #tpu.memory_space<vmem>>, vector<1x1x64xf32>,
    return
  }
  func.func @transform_0(%arg0: i32) -> (i32, i32, i32) {
    %c0_i32 = arith.constant 0 : i32
    %c0_i32_0 = arith.constant 0 : i32
    %c0_i32_1 = arith.constant 0 : i32
    return %arg0, %c0_i32, %c0_i32_0 : i32, i32, i32
  }
  func.func @transform_1(%arg0: i32) -> (i32, i32) {
    %c0_i32 = arith.constant 0 : i32
    %c0_i32_0 = arith.constant 0 : i32
    %c0_i32_1 = arith.constant 0 : i32
    return %c0_i32, %c0_i32_0 : i32, i32
  }
  func.func @transform_2(%arg0: i32) -> (i32, i32) {
    %c0_i32 = arith.constant 0 : i32
    %c0_i32_0 = arith.constant 0 : i32
    %c0_i32_1 = arith.constant 0 : i32
    return %c0_i32, %c0_i32_0 : i32, i32
  }
  func.func @transform_3(%arg0: i32) -> (i32, i32) {
    %c0_i32 = arith.constant 0 : i32
    %c0_i32_0 = arith.constant 0 : i32
    %c0_i32_1 = arith.constant 0 : i32
    return %c0_i32, %c0_i32_0 : i32, i32
  }
  func.func @transform_4(%arg0: i32) -> (i32, i32, i32) {
    %c0_i32 = arith.constant 0 : i32
    %c0_i32_0 = arith.constant 0 : i32
    %c0_i32_1 = arith.constant 0 : i32
    return %arg0, %c0_i32, %c0_i32_0 : i32, i32, i32
  }
}

</mosaic_0001>

<bundles_post_ra>
// kernel: tpu_custom_call.1
= control target key start
LH: loop header
LB: loop body
LE: loop exit
PB: predicated region body
PF: predicated region fallthrough
CT: control target
= control target key end

     0   :  { %9 = vsyncpa [#allocation3], 0  ;;  %s879_s0 = inlined_call_operand.vmem [shape: f32[2,64,49], index: 0, kind: input, shape index: {}]   ;;  %s880_s1 = inlined_call_operand.vmem [shape: f32[64,49], index: 1, kind: input, shape index: {}]   ;;  %s881_s2 = inlined_call_operand.vmem [shape: f32[64,4], index: 2, kind: input, shape index: {}]   ;;  %s882_s3 = inlined_call_operand.vmem [shape: f32[4,64], index: 3, kind: input, shape index: {}]   ;;  %s883_s4 = inlined_call_operand.hbm [shape: f32[2,1,64], index: 4, kind: output, shape index: {}]  }
   0x1   :  { %11 = vsyncpa [#allocation3 + $0x1], 0  ;;  %s727_s15 = smov 0   ;;  %s729_s16 = smov 0  }
   0x2   :  { %s731_s17 = smov 0   ;;  %s733_s18 = smov 0  }
   0x3 LB: > { %s748_s19 = sadd.s32 4294967295, %s697_s18   ;;  %s544_s20 = sadd.s32 4294967294, %s697_s18   ;;  %s697_s18 = sphi %s733_s18, %s889_s18   ;;  %s693_s17 = sphi %s731_s17, %s888_s17   ;;  %s689_s16 = sphi %s729_s16, %s887_s16   ;;  %s685_s15 = sphi %s727_s15, %s886_s15  }
   0x4   : > { %s752_s21 = sadd.s32 1, %s697_s18   ;;  %s113_s22 = sadd.s32 1, %s693_s17 }
   0x5   : > { %s110_s23 = ssub.s32 %s697_s18, %s752_s21  ;;  %p123_p0 = scmp.ne.s32.totalorder %s693_s17, %s689_s16 }
   0x6   : > { %p111_p1 = scmp.eq.s32.totalorder %s110_s23, 0  ;;  %p124_p2 = scmp.eq.s32.totalorder %s748_s19, 1 }
   0x7   : > { %p129_p3 = scmp.ne.s32.totalorder %s689_s16, %s685_s15  ;;  %p130_p4 = scmp.eq.s32.totalorder %s544_s20, 1 }
   0x8   : > { %s763_s24 = scalar_select %p111_p1, %s693_s17, %s113_s22  }
   0x9   : > { %p765_p5 = por %p124_p2, %p123_p0  ;;  %p769_p6 = por %p130_p4, %p129_p3 }
   0xa   : > { %p547_p7 = scmp.ge.s32.totalorder %s697_s18, 1  ;;  %p165_p8 = scmp.lt.s32.totalorder %s697_s18, 3 }
   0xc   : > { %p166_p9 = pnand %p547_p7, %p165_p8 }
   0xd   : > { %p190_p10 = scmp.lt.s32.totalorder (!%p166_p9), %s748_s19, 1  ;;  %s188_s6 = sand.u32 (!%p166_p9), 1, %s689_s16  }
   0xe   : > { %169 = sbr.rel (%p166_p9) target bundleno = 616 (0x268), region = 36  ;;  %s553_s7 = sshll.u32 (!%p166_p9), %s748_s19, 4 }
   0xf   : > { %s189_s8 = scalar_lea.vmem (!%p166_p9), [#allocation2], %s188_s6  ;;  %s844_s12 = scalar_lea.hbm (!%p166_p9), %s883_s4, %s553_s7 }
  0x10   : > { %s489_s9 = sshll.u32 (!%p166_p9), %s189_s8, 4  ;;  %s477_s13 = scalar_lea.sflag (!%p166_p9), [#allocation3], %s188_s6  ;;  %s490_s9 = int_to_ptr.vmem [resolvable:$true] %s489_s9 }
  0x11   : > { %s637_s14 = scalar_lea.vmem (!%p166_p9), %s490_s9, 16  ;;  %s701_s20 = smov (!%p166_p9), [#allocation2]  }
  0x12   : > { %p638_p11 = scmp.ne.s32.totalorder (!%p166_p9), %s490_s9, %s637_s14  ;;  %s641_s22 = sshll.u32 (!%p166_p9), %s701_s20, 4  ;;  %s642_s22 = int_to_ptr.vmem [resolvable:$false] %s641_s22 }
  0x13   : > { %s191_s27 = scalar_select %p190_p10, %s748_s19, 1  ;;  %v203_v0 = vld [vmem:[%s880_s1] sm:$0xff]  ;;  %v205_v1 = vld [vmem:[%s880_s1 + $0x10] sm:$0xff]  ;;  %v204_v2 = vld [vmem:[%s880_s1 + $0x8] sm:$0xff]  ;;  %vm219_vm0 = vcmask 400384   ;;  %v699_v32 = vmov 0.0   ;;  %v260_v41 = vlaneseq }
  0x14   : > { %v206_v3 = vld [vmem:[%s880_s1 + $0x18] sm:$0xff]  ;;  %v207_v11 = vld [vmem:[%s880_s1 + $0x20] sm:$0xff]  ;;  %v208_v15 = vld [vmem:[%s880_s1 + $0x28] sm:$0xff]  ;;  %568 = vmatprep.subr.mxu0 %v699_v32  ;;  %587 = vmatprep.subr.mxu1 %v699_v32  ;;  %vm700_vm1 = vmmov 0   ;;  %vm271_vm2 = vcmask 130112   ;;  %vm278_vm3 = vcmask 195712   ;;  %p639_p12 = pnand %p638_p11, %p765_p5  ;;  %p644_p0 = scmp.lt.s32.totalorder %s490_s9, %s642_s22 }
  0x15   : > { %s556_s28 = sshll.u32 %s191_s27, 6  ;;  %v209_v22 = vld [vmem:[%s880_s1 + $0x30] sm:$0xff]  ;;  %v210_v25 = vld [vmem:[%s880_s1 + $0x38] sm:$0xff]  ;;  %v249_v35 = vld [vmem:[%s881_s2 + $0x28] sm:$0xff]  ;;  %584 = vmatprep.mubr.msk.f32.mxu0 %vm700_vm1, %v699_v32  ;;  %589 = vmatprep.mubr.msk.f32.mxu1 %vm700_vm1, %v699_v32  ;;  %v261_v42 = vand.u32 127, %v260_v41  ;;  %v263_v43 = vshrl.u32 %v260_v41, 7 }
  0x16   : > { %s194_s11 = scalar_lea.vmem %s879_s0, %s556_s28  ;;  %v251_v33 = vld [vmem:[%s881_s2 + $0x38] sm:$0xff]  ;;  %v250_v34 = vld [vmem:[%s881_s2 + $0x30] sm:$0xff]  ;;  %v248_v36 = vld [vmem:[%s881_s2 + $0x20] sm:$0xff]  ;;  %vm285_vm4 = vcmask 261312   ;;  %vm292_vm5 = vcmask 326912   ;;  %vm299_vm6 = vcmask 392512   ;;  %p640_p13 = pneg %p639_p12 }
  0x17   : > { %v195_v4 = vld [vmem:[%s194_s11] sm:$0xff]  ;;  %v197_v5 = vld [vmem:[%s194_s11 + $0x10] sm:$0xff]  ;;  %v196_v6 = vld [vmem:[%s194_s11 + $0x8] sm:$0xff]  ;;  %569 = vmatpush3.msra.mxu0 %v251_v33  ;;  %v266_v44 = vadd.s32 4294967288, %v261_v42  ;;  %v280_v45 = vadd.s32 4294967272, %v261_v42  ;;  %v273_v46 = vadd.s32 4294967280, %v261_v42  ;;  %v264_v50 = vsub.s32 %v261_v42, %v263_v43 }
  0x18   : > { %v211_v7 = vmul.f32 %v203_v0, %v195_v4  ;;  %v213_v8 = vmul.f32 %v205_v1, %v197_v5  ;;  %v212_v9 = vmul.f32 %v204_v2, %v196_v6  ;;  %v198_v10 = vld [vmem:[%s194_s11 + $0x18] sm:$0xff]  ;;  %v199_v13 = vld [vmem:[%s194_s11 + $0x20] sm:$0xff]  ;;  %v200_v14 = vld [vmem:[%s194_s11 + $0x28] sm:$0xff]  ;;  %570 = vmatprep.subr.mxu0 %v699_v32  ;;  %v287_v49 = vadd.s32 4294967264, %v261_v42  ;;  %s643_s19 = scalar_lea.vmem %s642_s22, 32 }
  0x19   : > { %v214_v12 = vmul.f32 %v206_v3, %v198_v10  ;;  %v215_v20 = vmul.f32 %v207_v11, %v199_v13  ;;  %v216_v21 = vmul.f32 %v208_v15, %v200_v14  ;;  %v201_v23 = vld [vmem:[%s194_s11 + $0x30] sm:$0xff]  ;;  %v202_v24 = vld [vmem:[%s194_s11 + $0x38] sm:$0xff]  ;;  %571 = vmatpush3.msra.mxu0 %v250_v34  ;;  %v245_v39 = vld [vmem:[%s881_s2 + $0x8] sm:$0xff]  ;;  %v269_v51 = vsub.s32 %v266_v44, %v263_v43  ;;  %p645_p1 = scmp.lt.s32.totalorder %s643_s19, %s637_s14 }
  0x1a   : > { %v220_v16 = vsel %vm219_vm0, %v211_v7, 0.0  ;;  %v226_v17 = vsel %vm219_vm0, %v213_v8, 0.0  ;;  %v223_v18 = vsel %vm219_vm0, %v212_v9, 0.0  ;;  %v217_v28 = vmul.f32 %v209_v22, %v201_v23  ;;  %572 = vmatprep.subr.mxu0 %v699_v32  ;;  %v247_v37 = vld [vmem:[%s881_s2 + $0x18] sm:$0xff]  ;;  %v246_v38 = vld [vmem:[%s881_s2 + $0x10] sm:$0xff]  ;;  %v244_v40 = vld [vmem:[%s881_s2] sm:$0xff] }
  0x1b   : > { %221 = vadd.xlane.f32.xlu0 %v220_v16  ;;  %227 = vadd.xlane.f32.xlu1 %v226_v17  ;;  %v229_v19 = vsel %vm219_vm0, %v214_v12, 0.0  ;;  %v232_v26 = vsel %vm219_vm0, %v215_v20, 0.0  ;;  %v235_v27 = vsel %vm219_vm0, %v216_v21, 0.0  ;;  %v218_v29 = vmul.f32 %v210_v25, %v202_v24  ;;  %p646_p2 = por %p645_p1, %p644_p0 }
  0x1c   : > { %v238_v30 = vsel %vm219_vm0, %v217_v28, 0.0  ;;  %573 = vmatpush3.msra.mxu0 %v249_v35  ;;  %v283_v52 = vsub.s32 %v280_v45, %v263_v43  ;;  %v276_v53 = vsub.s32 %v273_v46, %v263_v43  ;;  %v294_v54 = vadd.s32 4294967256, %v261_v42 }
  0x1d   : > { %v241_v31 = vsel %vm219_vm0, %v218_v29, 0.0  ;;  %574 = vmatprep.subr.mxu0 %v699_v32  ;;  %v290_v57 = vsub.s32 %v287_v49, %v263_v43  ;;  %v301_v58 = vadd.s32 4294967248, %v261_v42  ;;  %v308_v62 = vadd.s32 4294967240, %v261_v42  ;;  %p647_p3 = pnand %p646_p2, %p640_p13 }
  0x1e   : > { %575 = vmatpush3.msra.mxu0 %v248_v36  ;;  %v297_v0 = vsub.s32 %v294_v54, %v263_v43  ;;  %vm306_vm7 = vcmask 458112   ;;  %vm313_vm8 = vcmask 523712   ;;  %vm315_vm9 = vcmask 523264  }
  0x1f   : > { %224 = vadd.xlane.f32.xlu0 %v223_v18  ;;  %230 = vadd.xlane.f32.xlu1 %v229_v19  ;;  %v304_v7 = vsub.s32 %v301_v58, %v263_v43  ;;  %v311_v8 = vsub.s32 %v308_v62, %v263_v43  ;;  %v389_v18 = vld [vmem:[%s882_s3] sm:$0xf]  ;;  %vm394_vm10 = vcmask 1043456   ;;  %vm390_vm11 = vcmask 31744  }
  0x20   : > { %576 = vmatprep.subr.mxu0 %v699_v32  ;;  %588 = vmatpush3.msk.msra.mxu1 %vm394_vm10, %v389_v18  ;;  %vm474_vm12 = vcmask 516096  }
  0x21   : > { %577 = vmatpush3.msra.mxu0 %v247_v37 }
  0x22   : > { %578 = vmatprep.subr.mxu0 %v699_v32 }
  0x23   : > { %233 = vadd.xlane.f32.xlu0 %v232_v26  ;;  %236 = vadd.xlane.f32.xlu1 %v235_v27 }
  0x24   : > { %579 = vmatpush3.msra.mxu0 %v246_v38 }
  0x25   : > { %580 = vmatprep.subr.mxu0 %v699_v32 }
  0x26   : > { %581 = vmatpush3.msra.mxu0 %v245_v39 }
  0x27   : > { %239 = vadd.xlane.f32.xlu0 %v238_v30  ;;  %242 = vadd.xlane.f32.xlu1 %v241_v31 }
  0x28   : > { %582 = vmatprep.subr.mxu0 %v699_v32 }
  0x29   : > { %583 = vmatpush3.msra.mxu0 %v244_v40 }
  0xa4   : > { %v222_v47 = vpop.xlane.xlu0 %221  ;;  %v228_v48 = vpop.xlane.xlu1 %227 }
  0xa5   : > { %v265_v59 = vrot.slane %v222_v47, %v264_v50  ;;  %v277_v63 = vrot.slane %v228_v48, %v276_v53 }
  0xa8   : > { %v225_v55 = vpop.xlane.xlu0 %224  ;;  %v231_v56 = vpop.xlane.xlu1 %230 }
  0xa9   : > { %v270_v60 = vrot.slane %v225_v55, %v269_v51  ;;  %v284_v61 = vrot.slane %v231_v56, %v283_v52 }
  0xab   : > { %v272_v1 = vsel %vm271_vm2, %v270_v60, %v265_v59 }
  0xac   : > { %v279_v2 = vsel %vm278_vm3, %v277_v63, %v272_v1  ;;  %v234_v3 = vpop.xlane.xlu0 %233  ;;  %v237_v4 = vpop.xlane.xlu1 %236 }
  0xad   : > { %v286_v5 = vsel %vm285_vm4, %v284_v61, %v279_v2  ;;  %v291_v6 = vrot.slane %v234_v3, %v290_v57  ;;  %v298_v9 = vrot.slane %v237_v4, %v297_v0 }
  0xaf   : > { %v293_v10 = vsel %vm292_vm5, %v291_v6, %v286_v5 }
  0xb0   : > { %v240_v11 = vpop.xlane.xlu0 %239  ;;  %v243_v12 = vpop.xlane.xlu1 %242  ;;  %v300_v15 = vsel %vm299_vm6, %v298_v9, %v293_v10 }
  0xb1   : > { %v305_v13 = vrot.slane %v240_v11, %v304_v7  ;;  %v312_v14 = vrot.slane %v243_v12, %v311_v8 }
  0xb3   : > { %v307_v16 = vsel %vm306_vm7, %v305_v13, %v300_v15 }
  0xb4   : > { %v314_v17 = vsel %vm313_vm8, %v312_v14, %v307_v16 }
  0xb5   : > { %585 = vmatmul.mubr.msk.f32.vlgmr.msra.gmra.mxu0 %vm315_vm9, %v314_v17 }
 0x175   : > { %v384_v19 = vpop.f32.mrf.mxu0 }
 0x176   : > { %v388_v20 = vmax.f32 %v384_v19, 0.0 }
 0x177   : > { %v586_v21 = vpop.f32.mrf.mxu0 }
 0x178   : > { %590 = vmatmul.mubr.msk.f32.vlgmr.msra.gmra.mxu1 %vm390_vm11, %v388_v20 }
 0x238   : > { %v464_v22 = vpop.f32.mrf.mxu1 }
 0x239   : > { %v468_v23 = vsub.f32 0.0, %v464_v22 }
 0x23a   : > { %v591_v24 = vpop.f32.mrf.mxu1 }
 0x23b   : > { %v469_v25 = vmul.f32 1.442695, %v468_v23 }
 0x23d   : > { %633 = vpow2.f32 %v469_v25 }
 0x24a   : > { %v634_v26 = vpop.eup %633 }
 0x24b   : > { %v471_v27 = vadd.f32 1.0, %v634_v26 }
 0x24d   : > { %635 = vrcp.f32 %v471_v27 }
 0x25a   : > { %v636_v28 = vpop.eup %635 }
 0x25b   : > { %475 = vst.msk [vmem:[%s189_s8] sm:$0x1] %vm474_vm12, %v636_v28 }
 0x25c   : > { %650 = shalt.err (!%p647_p3)
}
 0x25d   : > { %s651_s23 = scalar_lea.hbm %s844_s12, 16  ;;  %s655_s29 = scalar_lea.hbm %s883_s4, 32 }
 0x25e   : > { %p652_p4 = scmp.ne.s32.totalorder %s844_s12, %s651_s23  ;;  %p656_p9 = scmp.lt.s32.totalorder %s844_s12, %s883_s4 }
 0x25f   : > { %p657_p10 = scmp.lt.s32.totalorder %s655_s29, %s651_s23 }
 0x260   : > { %p653_p7 = pnand %p652_p4, %p765_p5 }
 0x261   : > { %p658_p11 = por %p657_p10, %p656_p9 }
 0x262   : > { %p654_p8 = pneg %p653_p7 }
 0x264   : > { %p659_p12 = pnand %p658_p11, %p654_p8 }
 0x266   : > { %662 = shalt.err (!%p659_p12)
}
 0x267   : > { %592 = dma.vmem_to_hbm [thread:$0]  (%p765_p5), %s490_s9, 16, %s844_s12, %s477_s13  }
 0x268 PF: > { %p598_p13 = scmp.ge.s32.totalorder %s697_s18, 2  ;;  %s501_s6 = sand.u32 1, %s685_s15  }
 0x269   : > { %s502_s7 = scalar_lea.sflag [#allocation3], %s501_s6 }
 0x26a   : > { %p595_p0 = pnand %p598_p13, %p769_p6 }
 0x26c   : > { %p596_p1 = pneg %p595_p0 }
 0x26e   : > { %680 = dma.done.wait (%p596_p1), %s502_s7, 16  }
 0x26f   : > { %682 = vsyncadd (%p596_p1), %s502_s7, 4294967280  ;;  %p14_p2 = scmp.ge.s32.totalorder %s752_s21, 4   ;;  %s886_s15 = smov %s689_s16 }
 0x270   : > { %s887_s16 = smov %s693_s17  ;;  %s888_s17 = smov %s763_s24 }
 0x271   : > { %s889_s18 = smov %s752_s21  ;;  %16 = sbr.rel (!%p14_p2) target bundleno = 3 (0x3), region = 71 }
 0x276   :  { %506 = vsyncpa [#allocation3], 1 }
 0x277   :  { %508 = vsyncpa [#allocation3 + $0x1], 1 }

</bundles_post_ra>
